<compile_context>
chip_gen: v6e
topology: v6e:2x2x1
jax: 0.10.0
libtpu: 0.0.40
codegen_flags: <defaults>
</compile_context>

<pallas_src>
import functools

import jax
import jax.numpy as jnp
from jax.experimental import pallas as pl
from jax.experimental.pallas import tpu as pltpu  # noqa: F401  (kept for clarity / future tiling)

BETA = 0.9      # membrane decay
THRESH = 1.0    # firing threshold (reset by subtraction)


def snn_kernel(x_ref, w1_ref, b1_ref, w2_ref, b2_ref, yt_ref, *, n_steps: int):
    n_t, b_p, c_p = yt_ref.shape
    h_p = w1_ref.shape[1]

    # Layer-1 current is time-invariant under the "repeat" replica -> hoist the big
    # (Bp, D) x (D, Hp) matmul out of the time loop entirely. bf16 operands, f32 acc.
    x = x_ref[...]                                                    # (Bp, D)  bf16
    cur1 = jnp.dot(x, w1_ref[...],
                   preferred_element_type=jnp.float32) + b1_ref[...]  # (Bp, Hp) f32

    w2 = w2_ref[...]                                                  # (Hp, Cp) bf16
    b2 = jnp.broadcast_to(b2_ref[...], (b_p, c_p))                    # hoisted broadcast (f32)

    mem1 = jnp.zeros((b_p, h_p), jnp.float32)                         # init_mems(): zeros
    mem2 = jnp.zeros((b_p, c_p), jnp.float32)

    # n_steps is a small static constant: a Python loop fully unrolls at trace time,
    # giving the LLO scheduler full visibility (equivalent to fori_loop(unroll=True)).
    for t in range(n_steps):
        # LIF layer 1 (all elementwise math in f32)
        m1 = BETA * mem1 + cur1
        s1 = (m1 > THRESH).astype(jnp.float32)
        mem1 = m1 - s1 * THRESH

        # Linear 2 (bf16 operands on the MXU, f32 accumulation) + LIF layer 2
        cur2 = jnp.dot(s1.astype(jnp.bfloat16), w2,
                       preferred_element_type=jnp.float32) + b2
        m2 = BETA * mem2 + cur2
        s2 = (m2 > THRESH).astype(jnp.float32)
        mem2 = m2 - s2 * THRESH

        # torch.stack(yt_list, dim=0): static-index, full-vreg (8 x 128) store.
        yt_ref[t] = s2


def _round_up(x: int, m: int) -> int:
    return (x + m - 1) // m * m


def _pad_to(a, shape):
    return jnp.pad(a, [(0, s - d) for d, s in zip(a.shape, shape)])


@functools.partial(jax.jit, static_argnames=("n_steps",))
def module_snn_forward(x_flat, w1, b1, w2, b2, n_steps: int):
    B, D = x_flat.shape
    H = w1.shape[1]
    C = w2.shape[1]

    Bp = _round_up(max(B, 8), 8)        # fill the 8-row sublane tile
    Dp = _round_up(D, 128)
    Hp = _round_up(H, 128)
    Cp = _round_up(C, 128)              # lane-dense output / full MXU result columns

    # Zero-padding is exact: padded hidden/output units get zero current and never
    # spike; padded batch rows are sliced away below.
    xp = _pad_to(x_flat, (Bp, Dp)).astype(jnp.bfloat16)
    w1p = _pad_to(w1, (Dp, Hp)).astype(jnp.bfloat16)
    b1p = _pad_to(b1, (1, Hp)).astype(jnp.float32)
    w2p = _pad_to(w2, (Hp, Cp)).astype(jnp.bfloat16)
    b2p = _pad_to(b2, (1, Cp)).astype(jnp.float32)

    yt_p = pl.pallas_call(
        functools.partial(snn_kernel, n_steps=n_steps),
        out_shape=jax.ShapeDtypeStruct((n_steps, Bp, Cp), jnp.float32),
        # No grid / BlockSpecs: the small padded operands are DMA'd to VMEM once,
        # everything is computed in a single invocation, and yt is written back once.
    )(xp, w1p, b1p, w2p, b2p)

    return yt_p[:, :B, :C]


def reference_forward(x_flat, w1, b1, w2, b2, n_steps: int):
    """Pure-JAX replica of ModuleSNN.forward.

    Matmul operands are cast to bf16 (then promoted to f32) to mirror the kernel's
    bf16 MXU matmuls; the LIF update is f32, like the kernel.
    """
    f32 = jnp.float32
    xb = x_flat.astype(jnp.bfloat16).astype(f32)
    w1b = w1.astype(jnp.bfloat16).astype(f32)
    w2b = w2.astype(jnp.bfloat16).astype(f32)
    B = x_flat.shape[0]
    H = w1.shape[1]
    C = w2.shape[1]
    mem1 = jnp.zeros((B, H), f32)
    mem2 = jnp.zeros((B, C), f32)
    yt = []
    for _ in range(n_steps):
        cur1 = xb @ w1b + b1
        m1 = BETA * mem1 + cur1
        s1 = (m1 > THRESH).astype(f32)
        mem1 = m1 - s1 * THRESH
        cur2 = s1 @ w2b + b2
        m2 = BETA * mem2 + cur2
        s2 = (m2 > THRESH).astype(f32)
        mem2 = m2 - s2 * THRESH
        yt.append(s2)
    return jnp.stack(yt, axis=0)


if __name__ == "__main__":
    key = jax.random.PRNGKey(0)
    kx, k1, k2, k3, k4 = jax.random.split(key, 5)

    n_steps = 4
    B, Cin, S = 2, 4, 16          # input like NCHW: (2, 4, 16, 16)
    D = Cin * S * S               # 1024 flattened features
    H = 128                       # hidden LIF layer width
    C = 10                        # number of classes

    x = jax.random.normal(kx, (B, Cin, S, S), jnp.float32)
    x_flat = x.reshape(B, D)

    # deterministic synthetic parameters
    w1 = jax.random.normal(k1, (D, H), jnp.float32) * 0.05
    b1 = jax.random.normal(k2, (1, H), jnp.float32) * 0.1
    w2 = jax.random.normal(k3, (H, C), jnp.float32) * 0.1
    b2 = jax.random.normal(k4, (1, C), jnp.float32) * 0.1

    yt = module_snn_forward(x_flat, w1, b1, w2, b2, n_steps)
    jax.block_until_ready(yt)

    yt_ref = reference_forward(x_flat, w1, b1, w2, b2, n_steps)
    assert yt.shape == (n_steps, B, C)
    # Spikes are binary; tiny f32 accumulation-order differences between the MXU and
    # the XLA reference could in principle flip a threshold-marginal spike, so allow
    # a tiny mismatch budget (review-sanctioned tolerance on spike counts).
    flips = float(jnp.sum(jnp.abs(yt - yt_ref)))
    assert flips <= 2.0, f"Pallas output mismatch vs reference ({flips} spike flips)"

    # equivalent of ModuleSNN.step(): rate-decode by summing spikes over time
    y_pred_l = yt.sum(axis=0).astype(jnp.float32)
    jax.block_until_ready(y_pred_l)

    print("KERNEL_OK")
</pallas_src>

<mosaic_0001>
module attributes {stable_mosaic.version = 11 : i64} {
  func.func @snn_kernel(%arg0: memref<8x1024xbf16, #tpu.memory_space<vmem>>, %arg1: memref<1024x128xbf16, #tpu.memory_space<vmem>>, %arg2: memref<1x128xf32, #tpu.memory_space<vmem>>, %arg3: memref<128x128xbf16, #tpu.memory_space<vmem>>, %arg4: memref<1x128xf32, #tpu.memory_space<vmem>>, %arg5: memref<4x8x128xf32, #tpu.memory_space<vmem>>) attributes {dimension_semantics = [], scalar_prefetch = 0 : i64, scratch_operands = 0 : i64, tpu.core_type = #tpu.core_type<tc>} {
    %c0 = arith.constant 0 : index
    %c0_0 = arith.constant 0 : index
    %0 = vector.load %arg0[%c0, %c0_0] : memref<8x1024xbf16, #tpu.memory_space<vmem>>, vector<8x1024xbf16>
    %c0_1 = arith.constant 0 : index
    %c0_2 = arith.constant 0 : index
    %1 = vector.load %arg1[%c0_1, %c0_2] : memref<1024x128xbf16, #tpu.memory_space<vmem>>, vector<1024x128xbf16>
    %cst = arith.constant dense<0.000000e+00> : vector<8x128xf32>
    %2 = tpu.matmul %0, %1, %cst {dimension_numbers = #tpu.dot_dimension_numbers<[1], [0], [0], [1], [0, 0, 1, 1], [], []>} : vector<8x1024xbf16>, vector<1024x128xbf16>, vector<8x128xf32> -> vector<8x128xf32>
    %c0_3 = arith.constant 0 : index
    %c0_4 = arith.constant 0 : index
    %3 = vector.load %arg2[%c0_3, %c0_4] : memref<1x128xf32, #tpu.memory_space<vmem>>, vector<1x128xf32>
    %4 = vector.broadcast %3 : vector<1x128xf32> to vector<8x128xf32>
    %5 = arith.addf %2, %4 : vector<8x128xf32>
    %c0_5 = arith.constant 0 : index
    %c0_6 = arith.constant 0 : index
    %6 = vector.load %arg3[%c0_5, %c0_6] : memref<128x128xbf16, #tpu.memory_space<vmem>>, vector<128x128xbf16>
    %c0_7 = arith.constant 0 : index
    %c0_8 = arith.constant 0 : index
    %7 = vector.load %arg4[%c0_7, %c0_8] : memref<1x128xf32, #tpu.memory_space<vmem>>, vector<1x128xf32>
    %8 = vector.shape_cast %7 : vector<1x128xf32> to vector<1x128xf32>
    %9 = vector.broadcast %8 : vector<1x128xf32> to vector<8x128xf32>
    %cst_9 = arith.constant 0.000000e+00 : f32
    %10 = vector.broadcast %cst_9 : f32 to vector<8x128xf32>
    %cst_10 = arith.constant 0.000000e+00 : f32
    %11 = vector.broadcast %cst_10 : f32 to vector<8x128xf32>
    %cst_11 = arith.constant 0.899999976 : f32
    %12 = vector.broadcast %cst_11 : f32 to vector<8x128xf32>
    %13 = arith.mulf %12, %10 : vector<8x128xf32>
    %14 = arith.addf %13, %5 : vector<8x128xf32>
    %cst_12 = arith.constant 1.000000e+00 : f32
    %15 = vector.broadcast %cst_12 : f32 to vector<8x128xf32>
    %16 = arith.cmpf ogt, %14, %15 : vector<8x128xf32>
    %17 = arith.extui %16 : vector<8x128xi1> to vector<8x128xi32>
    %18 = arith.sitofp %17 : vector<8x128xi32> to vector<8x128xf32>
    %cst_13 = arith.constant 1.000000e+00 : f32
    %19 = vector.broadcast %cst_13 : f32 to vector<8x128xf32>
    %20 = arith.mulf %18, %19 : vector<8x128xf32>
    %21 = arith.subf %14, %20 : vector<8x128xf32>
    %22 = arith.truncf %18 : vector<8x128xf32> to vector<8x128xbf16>
    %cst_14 = arith.constant dense<0.000000e+00> : vector<8x128xf32>
    %23 = tpu.matmul %22, %6, %cst_14 {dimension_numbers = #tpu.dot_dimension_numbers<[1], [0], [0], [1], [0, 0, 1, 1], [], []>} : vector<8x128xbf16>, vector<128x128xbf16>, vector<8x128xf32> -> vector<8x128xf32>
    %24 = arith.addf %23, %9 : vector<8x128xf32>
    %cst_15 = arith.constant 0.899999976 : f32
    %25 = vector.broadcast %cst_15 : f32 to vector<8x128xf32>
    %26 = arith.mulf %25, %11 : vector<8x128xf32>
    %27 = arith.addf %26, %24 : vector<8x128xf32>
    %cst_16 = arith.constant 1.000000e+00 : f32
    %28 = vector.broadcast %cst_16 : f32 to vector<8x128xf32>
    %29 = arith.cmpf ogt, %27, %28 : vector<8x128xf32>
    %30 = arith.extui %29 : vector<8x128xi1> to vector<8x128xi32>
    %31 = arith.sitofp %30 : vector<8x128xi32> to vector<8x128xf32>
    %cst_17 = arith.constant 1.000000e+00 : f32
    %32 = vector.broadcast %cst_17 : f32 to vector<8x128xf32>
    %33 = arith.mulf %31, %32 : vector<8x128xf32>
    %34 = arith.subf %27, %33 : vector<8x128xf32>
    %c0_18 = arith.constant 0 : index
    %c0_19 = arith.constant 0 : index
    %c0_20 = arith.constant 0 : index
    %35 = vector.load %arg5[%c0_18, %c0_19, %c0_20] : memref<4x8x128xf32, #tpu.memory_space<vmem>>, vector<1x8x128xf32>
    %36 = vector.shape_cast %35 : vector<1x8x128xf32> to vector<8x128xf32>
    %37 = vector.shape_cast %31 : vector<8x128xf32> to vector<1x8x128xf32>
    tpu.vector_store %arg5[%c0_18, %c0_19, %c0_20], %37 {strides = array<i32>} : memref<4x8x128xf32, #tpu.memory_space<vmem>>, vector<1x8x128xf32>,
    %cst_21 = arith.constant 0.899999976 : f32
    %38 = vector.broadcast %cst_21 : f32 to vector<8x128xf32>
    %39 = arith.mulf %38, %21 : vector<8x128xf32>
    %40 = arith.addf %39, %5 : vector<8x128xf32>
    %cst_22 = arith.constant 1.000000e+00 : f32
    %41 = vector.broadcast %cst_22 : f32 to vector<8x128xf32>
    %42 = arith.cmpf ogt, %40, %41 : vector<8x128xf32>
    %43 = arith.extui %42 : vector<8x128xi1> to vector<8x128xi32>
    %44 = arith.sitofp %43 : vector<8x128xi32> to vector<8x128xf32>
    %cst_23 = arith.constant 1.000000e+00 : f32
    %45 = vector.broadcast %cst_23 : f32 to vector<8x128xf32>
    %46 = arith.mulf %44, %45 : vector<8x128xf32>
    %47 = arith.subf %40, %46 : vector<8x128xf32>
    %48 = arith.truncf %44 : vector<8x128xf32> to vector<8x128xbf16>
    %cst_24 = arith.constant dense<0.000000e+00> : vector<8x128xf32>
    %49 = tpu.matmul %48, %6, %cst_24 {dimension_numbers = #tpu.dot_dimension_numbers<[1], [0], [0], [1], [0, 0, 1, 1], [], []>} : vector<8x128xbf16>, vector<128x128xbf16>, vector<8x128xf32> -> vector<8x128xf32>
    %50 = arith.addf %49, %9 : vector<8x128xf32>
    %cst_25 = arith.constant 0.899999976 : f32
    %51 = vector.broadcast %cst_25 : f32 to vector<8x128xf32>
    %52 = arith.mulf %51, %34 : vector<8x128xf32>
    %53 = arith.addf %52, %50 : vector<8x128xf32>
    %cst_26 = arith.constant 1.000000e+00 : f32
    %54 = vector.broadcast %cst_26 : f32 to vector<8x128xf32>
    %55 = arith.cmpf ogt, %53, %54 : vector<8x128xf32>
    %56 = arith.extui %55 : vector<8x128xi1> to vector<8x128xi32>
    %57 = arith.sitofp %56 : vector<8x128xi32> to vector<8x128xf32>
    %cst_27 = arith.constant 1.000000e+00 : f32
    %58 = vector.broadcast %cst_27 : f32 to vector<8x128xf32>
    %59 = arith.mulf %57, %58 : vector<8x128xf32>
    %60 = arith.subf %53, %59 : vector<8x128xf32>
    %c1 = arith.constant 1 : index
    %c0_28 = arith.constant 0 : index
    %c0_29 = arith.constant 0 : index
    %61 = vector.load %arg5[%c1, %c0_28, %c0_29] : memref<4x8x128xf32, #tpu.memory_space<vmem>>, vector<1x8x128xf32>
    %62 = vector.shape_cast %61 : vector<1x8x128xf32> to vector<8x128xf32>
    %63 = vector.shape_cast %57 : vector<8x128xf32> to vector<1x8x128xf32>
    tpu.vector_store %arg5[%c1, %c0_28, %c0_29], %63 {strides = array<i32>} : memref<4x8x128xf32, #tpu.memory_space<vmem>>, vector<1x8x128xf32>,
    %cst_30 = arith.constant 0.899999976 : f32
    %64 = vector.broadcast %cst_30 : f32 to vector<8x128xf32>
    %65 = arith.mulf %64, %47 : vector<8x128xf32>
    %66 = arith.addf %65, %5 : vector<8x128xf32>
    %cst_31 = arith.constant 1.000000e+00 : f32
    %67 = vector.broadcast %cst_31 : f32 to vector<8x128xf32>
    %68 = arith.cmpf ogt, %66, %67 : vector<8x128xf32>
    %69 = arith.extui %68 : vector<8x128xi1> to vector<8x128xi32>
    %70 = arith.sitofp %69 : vector<8x128xi32> to vector<8x128xf32>
    %cst_32 = arith.constant 1.000000e+00 : f32
    %71 = vector.broadcast %cst_32 : f32 to vector<8x128xf32>
    %72 = arith.mulf %70, %71 : vector<8x128xf32>
    %73 = arith.subf %66, %72 : vector<8x128xf32>
    %74 = arith.truncf %70 : vector<8x128xf32> to vector<8x128xbf16>
    %cst_33 = arith.constant dense<0.000000e+00> : vector<8x128xf32>
    %75 = tpu.matmul %74, %6, %cst_33 {dimension_numbers = #tpu.dot_dimension_numbers<[1], [0], [0], [1], [0, 0, 1, 1], [], []>} : vector<8x128xbf16>, vector<128x128xbf16>, vector<8x128xf32> -> vector<8x128xf32>
    %76 = arith.addf %75, %9 : vector<8x128xf32>
    %cst_34 = arith.constant 0.899999976 : f32
    %77 = vector.broadcast %cst_34 : f32 to vector<8x128xf32>
    %78 = arith.mulf %77, %60 : vector<8x128xf32>
    %79 = arith.addf %78, %76 : vector<8x128xf32>
    %cst_35 = arith.constant 1.000000e+00 : f32
    %80 = vector.broadcast %cst_35 : f32 to vector<8x128xf32>
    %81 = arith.cmpf ogt, %79, %80 : vector<8x128xf32>
    %82 = arith.extui %81 : vector<8x128xi1> to vector<8x128xi32>
    %83 = arith.sitofp %82 : vector<8x128xi32> to vector<8x128xf32>
    %cst_36 = arith.constant 1.000000e+00 : f32
    %84 = vector.broadcast %cst_36 : f32 to vector<8x128xf32>
    %85 = arith.mulf %83, %84 : vector<8x128xf32>
    %86 = arith.subf %79, %85 : vector<8x128xf32>
    %c2 = arith.constant 2 : index
    %c0_37 = arith.constant 0 : index
    %c0_38 = arith.constant 0 : index
    %87 = vector.load %arg5[%c2, %c0_37, %c0_38] : memref<4x8x128xf32, #tpu.memory_space<vmem>>, vector<1x8x128xf32>
    %88 = vector.shape_cast %87 : vector<1x8x128xf32> to vector<8x128xf32>
    %89 = vector.shape_cast %83 : vector<8x128xf32> to vector<1x8x128xf32>
    tpu.vector_store %arg5[%c2, %c0_37, %c0_38], %89 {strides = array<i32>} : memref<4x8x128xf32, #tpu.memory_space<vmem>>, vector<1x8x128xf32>,
    %cst_39 = arith.constant 0.899999976 : f32
    %90 = vector.broadcast %cst_39 : f32 to vector<8x128xf32>
    %91 = arith.mulf %90, %73 : vector<8x128xf32>
    %92 = arith.addf %91, %5 : vector<8x128xf32>
    %cst_40 = arith.constant 1.000000e+00 : f32
    %93 = vector.broadcast %cst_40 : f32 to vector<8x128xf32>
    %94 = arith.cmpf ogt, %92, %93 : vector<8x128xf32>
    %95 = arith.extui %94 : vector<8x128xi1> to vector<8x128xi32>
    %96 = arith.sitofp %95 : vector<8x128xi32> to vector<8x128xf32>
    %97 = arith.truncf %96 : vector<8x128xf32> to vector<8x128xbf16>
    %cst_41 = arith.constant dense<0.000000e+00> : vector<8x128xf32>
    %98 = tpu.matmul %97, %6, %cst_41 {dimension_numbers = #tpu.dot_dimension_numbers<[1], [0], [0], [1], [0, 0, 1, 1], [], []>} : vector<8x128xbf16>, vector<128x128xbf16>, vector<8x128xf32> -> vector<8x128xf32>
    %99 = arith.addf %98, %9 : vector<8x128xf32>
    %cst_42 = arith.constant 0.899999976 : f32
    %100 = vector.broadcast %cst_42 : f32 to vector<8x128xf32>
    %101 = arith.mulf %100, %86 : vector<8x128xf32>
    %102 = arith.addf %101, %99 : vector<8x128xf32>
    %cst_43 = arith.constant 1.000000e+00 : f32
    %103 = vector.broadcast %cst_43 : f32 to vector<8x128xf32>
    %104 = arith.cmpf ogt, %102, %103 : vector<8x128xf32>
    %105 = arith.extui %104 : vector<8x128xi1> to vector<8x128xi32>
    %106 = arith.sitofp %105 : vector<8x128xi32> to vector<8x128xf32>
    %c3 = arith.constant 3 : index
    %c0_44 = arith.constant 0 : index
    %c0_45 = arith.constant 0 : index
    %107 = vector.load %arg5[%c3, %c0_44, %c0_45] : memref<4x8x128xf32, #tpu.memory_space<vmem>>, vector<1x8x128xf32>
    %108 = vector.shape_cast %107 : vector<1x8x128xf32> to vector<8x128xf32>
    %109 = vector.shape_cast %106 : vector<8x128xf32> to vector<1x8x128xf32>
    tpu.vector_store %arg5[%c3, %c0_44, %c0_45], %109 {strides = array<i32>} : memref<4x8x128xf32, #tpu.memory_space<vmem>>, vector<1x8x128xf32>,
    return
  }
}

</mosaic_0001>

<bundles_post_ra>
// kernel: module_snn_forward.1
= control target key start
LH: loop header
LB: loop body
LE: loop exit
PB: predicated region body
PF: predicated region fallthrough
CT: control target
= control target key end

     0   :  { %vm1411_vm0 = vmmov 0   ;;  %s1784_s1 = inlined_call_operand.vmem [shape: bf16[1024,128], index: 1, kind: input, shape index: {}]   ;;  %s1785_s0 = inlined_call_operand.vmem [shape: bf16[8,1024], index: 0, kind: input, shape index: {}]   ;;  %s1786_s3 = inlined_call_operand.vmem [shape: bf16[128,128], index: 3, kind: input, shape index: {}]   ;;  %s1787_s2 = inlined_call_operand.vmem [shape: f32[1,128], index: 2, kind: input, shape index: {}]   ;;  %s1788_s4 = inlined_call_operand.vmem [shape: f32[1,128], index: 4, kind: input, shape index: {}]   ;;  %s1789_s5 = inlined_call_operand.vmem [shape: f32[4,8,128], index: 5, kind: output, shape index: {}]  }
   0x1   :  { %v1330_v0 = vld [vmem:[%s1784_s1 + $0x78] sm:$0xff]   ;;  %v1334_v4 = vld [vmem:[%s1784_s1 + $0x70] sm:$0xff]   ;;  %v1338_v8 = vld [vmem:[%s1784_s1 + $0x68] sm:$0xff]  }
   0x2   :  { %v1331_v1 = vld [vmem:[%s1784_s1 + $0xf8] sm:$0xff]   ;;  %1123 = vmatprep.subr.bf16.mxu0 %v1330_v0  ;;  %v1335_v5 = vld [vmem:[%s1784_s1 + $0xf0] sm:$0xff]   ;;  %v1339_v9 = vld [vmem:[%s1784_s1 + $0xe8] sm:$0xff]  }
   0x3   :  { %v1332_v2 = vld [vmem:[%s1784_s1 + $0x38] sm:$0xff]   ;;  %1145 = vmatprep.subr.bf16.mxu1 %v1331_v1  ;;  %v1336_v6 = vld [vmem:[%s1784_s1 + $0x30] sm:$0xff]   ;;  %v1340_v10 = vld [vmem:[%s1784_s1 + $0x28] sm:$0xff]  }
   0x4   :  { %v1333_v3 = vld [vmem:[%s1784_s1 + $0xb8] sm:$0xff]   ;;  %1124 = vmatpush3.bf16.msra.mxu0 %v1332_v2  ;;  %v1337_v7 = vld [vmem:[%s1784_s1 + $0xb0] sm:$0xff]   ;;  %v1341_v11 = vld [vmem:[%s1784_s1 + $0xa8] sm:$0xff]  }
   0x5   :  { %1146 = vmatpush3.bf16.msra.mxu1 %v1333_v3  ;;  %1125 = vmatprep.subr.bf16.mxu0 %v1334_v4  ;;  %v1342_v12 = vld [vmem:[%s1784_s1 + $0x60] sm:$0xff]   ;;  %v1346_v16 = vld [vmem:[%s1784_s1 + $0x58] sm:$0xff]   ;;  %v1350_v20 = vld [vmem:[%s1784_s1 + $0x50] sm:$0xff]  }
   0x6   :  { %1147 = vmatprep.subr.bf16.mxu1 %v1335_v5  ;;  %v1343_v13 = vld [vmem:[%s1784_s1 + $0xe0] sm:$0xff]   ;;  %v1347_v17 = vld [vmem:[%s1784_s1 + $0xd8] sm:$0xff]   ;;  %v1351_v21 = vld [vmem:[%s1784_s1 + $0xd0] sm:$0xff]  }
   0x7   :  { %v1344_v14 = vld [vmem:[%s1784_s1 + $0x20] sm:$0xff]   ;;  %v1348_v18 = vld [vmem:[%s1784_s1 + $0x18] sm:$0xff]   ;;  %v1352_v22 = vld [vmem:[%s1784_s1 + $0x10] sm:$0xff]  }
   0x8   :  { %1126 = vmatpush3.bf16.msra.mxu0 %v1336_v6  ;;  %v1345_v15 = vld [vmem:[%s1784_s1 + $0xa0] sm:$0xff]   ;;  %v1349_v19 = vld [vmem:[%s1784_s1 + $0x98] sm:$0xff]   ;;  %v1353_v23 = vld [vmem:[%s1784_s1 + $0x90] sm:$0xff]  }
   0x9   :  { %1148 = vmatpush3.bf16.msra.mxu1 %v1337_v7  ;;  %1127 = vmatprep.subr.bf16.mxu0 %v1338_v8  ;;  %v1354_v24 = vld [vmem:[%s1784_s1 + $0x48] sm:$0xff]   ;;  %v1358_v28 = vld [vmem:[%s1784_s1 + $0x40] sm:$0xff]   ;;  %v1366_v38 = vld [vmem:[%s1784_s1 + $0x178] sm:$0xff]  }
   0xa   :  { %1149 = vmatprep.subr.bf16.mxu1 %v1339_v9  ;;  %v1355_v25 = vld [vmem:[%s1784_s1 + $0xc8] sm:$0xff]   ;;  %v1359_v29 = vld [vmem:[%s1784_s1 + $0xc0] sm:$0xff]   ;;  %v1367_v39 = vld [vmem:[%s1784_s1 + $0x1f8] sm:$0xff]  }
   0xb   :  { %v1356_v26 = vld [vmem:[%s1784_s1 + $0x8] sm:$0xff]   ;;  %v1360_v30 = vld [vmem:[%s1784_s1] sm:$0xff]   ;;  %v1368_v40 = vld [vmem:[%s1784_s1 + $0x138] sm:$0xff]  }
   0xc   :  { %1128 = vmatpush3.bf16.msra.mxu0 %v1340_v10  ;;  %v1357_v27 = vld [vmem:[%s1784_s1 + $0x88] sm:$0xff]   ;;  %v1361_v31 = vld [vmem:[%s1784_s1 + $0x80] sm:$0xff]   ;;  %v1369_v41 = vld [vmem:[%s1784_s1 + $0x1b8] sm:$0xff]  }
   0xd   :  { %1150 = vmatpush3.bf16.msra.mxu1 %v1341_v11  ;;  %1129 = vmatprep.subr.bf16.mxu0 %v1342_v12  ;;  %v21_v32 = vld [vmem:[%s1785_s0] sm:$0xff]  ;;  %v22_v33 = vld [vmem:[%s1785_s0 + $0x8] sm:$0xff]  ;;  %v1370_v42 = vld [vmem:[%s1784_s1 + $0x170] sm:$0xff]   ;;  %v1410_v12 = vmov 0.0  }
   0xe   :  { %1151 = vmatprep.subr.bf16.mxu1 %v1343_v13  ;;  %v1023_v34 = vcombine.low %v21_v32, %v21_v32  ;;  %v1024_v35 = vcombine.high %v21_v32, %v21_v32  ;;  %v1025_v36 = vcombine.low %v22_v33, %v22_v33  ;;  %v1026_v37 = vcombine.high %v22_v33, %v22_v33  ;;  %v1371_v43 = vld [vmem:[%s1784_s1 + $0x1f0] sm:$0xff]   ;;  %v1374_v46 = vld [vmem:[%s1784_s1 + $0x168] sm:$0xff]   ;;  %v1378_v50 = vld [vmem:[%s1784_s1 + $0x160] sm:$0xff]  }
   0xf   :  { %v1372_v44 = vld [vmem:[%s1784_s1 + $0x130] sm:$0xff]   ;;  %v1375_v47 = vld [vmem:[%s1784_s1 + $0x1e8] sm:$0xff]   ;;  %v1379_v51 = vld [vmem:[%s1784_s1 + $0x1e0] sm:$0xff]  }
  0x10   :  { %1130 = vmatpush3.bf16.msra.mxu0 %v1344_v14  ;;  %604 = vmatprep.mubr.bf16.mxu0 %v1024_v35  ;;  %v1373_v45 = vld [vmem:[%s1784_s1 + $0x1b0] sm:$0xff]   ;;  %v1376_v48 = vld [vmem:[%s1784_s1 + $0x128] sm:$0xff]   ;;  %v1380_v52 = vld [vmem:[%s1784_s1 + $0x120] sm:$0xff]  }
  0x11   :  { %1152 = vmatpush3.bf16.msra.mxu1 %v1345_v15  ;;  %1131 = vmatprep.subr.bf16.mxu0 %v1346_v16  ;;  %v1377_v49 = vld [vmem:[%s1784_s1 + $0x1a8] sm:$0xff]   ;;  %v1381_v53 = vld [vmem:[%s1784_s1 + $0x1a0] sm:$0xff]   ;;  %v1382_v54 = vld [vmem:[%s1784_s1 + $0x158] sm:$0xff]  }
  0x12   :  { %1153 = vmatprep.subr.bf16.mxu1 %v1347_v17  ;;  %644 = vmatprep.mubr.bf16.mxu1 %v1026_v37  ;;  %v1383_v55 = vld [vmem:[%s1784_s1 + $0x1d8] sm:$0xff]   ;;  %v1386_v58 = vld [vmem:[%s1784_s1 + $0x150] sm:$0xff]   ;;  %v1390_v62 = vld [vmem:[%s1784_s1 + $0x148] sm:$0xff]  }
  0x13   :  { %v1384_v56 = vld [vmem:[%s1784_s1 + $0x118] sm:$0xff]   ;;  %v1387_v59 = vld [vmem:[%s1784_s1 + $0x1d0] sm:$0xff]   ;;  %v1391_v63 = vld [vmem:[%s1784_s1 + $0x1c8] sm:$0xff]  }
  0x14   :  { %1132 = vmatpush3.bf16.msra.mxu0 %v1348_v18  ;;  %v1385_v57 = vld [vmem:[%s1784_s1 + $0x198] sm:$0xff]   ;;  %v1388_v60 = vld [vmem:[%s1784_s1 + $0x110] sm:$0xff]   ;;  %v1392_v0 = vld [vmem:[%s1784_s1 + $0x108] sm:$0xff]  }
  0x15   :  { %1154 = vmatpush3.bf16.msra.mxu1 %v1349_v19  ;;  %1133 = vmatprep.subr.bf16.mxu0 %v1350_v20  ;;  %v1389_v61 = vld [vmem:[%s1784_s1 + $0x190] sm:$0xff]   ;;  %v1393_v1 = vld [vmem:[%s1784_s1 + $0x188] sm:$0xff]   ;;  %v1394_v2 = vld [vmem:[%s1784_s1 + $0x140] sm:$0xff]  }
  0x16   :  { %1155 = vmatprep.subr.bf16.mxu1 %v1351_v21  ;;  %v1395_v3 = vld [vmem:[%s1784_s1 + $0x1c0] sm:$0xff]   ;;  %v23_v6 = vld [vmem:[%s1785_s0 + $0x10] sm:$0xff]  ;;  %v24_v9 = vld [vmem:[%s1785_s0 + $0x18] sm:$0xff] }
  0x17   :  { %v1396_v4 = vld [vmem:[%s1784_s1 + $0x100] sm:$0xff]   ;;  %v1027_v7 = vcombine.low %v23_v6, %v23_v6  ;;  %v1028_v8 = vcombine.high %v23_v6, %v23_v6  ;;  %v1029_v10 = vcombine.low %v24_v9, %v24_v9  ;;  %v1030_v11 = vcombine.high %v24_v9, %v24_v9  ;;  %v1651_v13 = vld [vmem:[%s1786_s3 + $0x38] sm:$0xff]   ;;  %v1658_v14 = vld [vmem:[%s1786_s3 + $0x30] sm:$0xff]  }
  0x18   :  { %1134 = vmatpush3.bf16.msra.mxu0 %v1352_v22  ;;  %v1397_v5 = vld [vmem:[%s1784_s1 + $0x180] sm:$0xff]   ;;  %v1666_v15 = vld [vmem:[%s1786_s3 + $0x28] sm:$0xff]   ;;  %v1685_v17 = vld [vmem:[%s1786_s3 + $0x18] sm:$0xff]  }
  0x19   :  { %1156 = vmatpush3.bf16.msra.mxu1 %v1353_v23  ;;  %1135 = vmatprep.subr.bf16.mxu0 %v1354_v24  ;;  %v1676_v16 = vld [vmem:[%s1786_s3 + $0x20] sm:$0xff]   ;;  %v1694_v18 = vld [vmem:[%s1786_s3 + $0x10] sm:$0xff]   ;;  %v1706_v19 = vld [vmem:[%s1786_s3 + $0x8] sm:$0xff]  }
  0x1a   :  { %1157 = vmatprep.subr.bf16.mxu1 %v1355_v25  ;;  %v1715_v20 = vld [vmem:[%s1786_s3] sm:$0xff]  }
  0x1c   :  { %1136 = vmatpush3.bf16.msra.mxu0 %v1356_v26 }
  0x1d   :  { %1158 = vmatpush3.bf16.msra.mxu1 %v1357_v27  ;;  %1137 = vmatprep.subr.bf16.mxu0 %v1358_v28 }
  0x1e   :  { %1159 = vmatprep.subr.bf16.mxu1 %v1359_v29 }
  0x20   :  { %1138 = vmatpush3.bf16.msra.mxu0 %v1360_v30  ;;  %v1022_v30 = vld [vmem:[%s1787_s2] ss:$0 sm:$0xff] }
  0x21   :  { %1160 = vmatpush3.bf16.msra.mxu1 %v1361_v31  ;;  %1167 = vmatprep.subr.bf16.mxu0 %v1366_v38 }
  0x22   :  { %1189 = vmatprep.subr.bf16.mxu1 %v1367_v39 }
  0x23   :  { %605 = vmatmul.mubr.bf16.vlgmr.msra.gmra.mxu0 %v1023_v34 }
  0x24   :  { %645 = vmatmul.mubr.bf16.vlgmr.msra.gmra.mxu1 %v1025_v36  ;;  %1168 = vmatpush3.bf16.msra.mxu0 %v1368_v40 }
  0x25   :  { %1190 = vmatpush3.bf16.msra.mxu1 %v1369_v41  ;;  %1169 = vmatprep.subr.bf16.mxu0 %v1370_v42 }
  0x26   :  { %1191 = vmatprep.subr.bf16.mxu1 %v1371_v43  ;;  %684 = vmatprep.mubr.bf16.mxu0 %v1028_v8 }
  0x27   :  { %724 = vmatprep.mubr.bf16.mxu1 %v1030_v11 }
  0x28   :  { %1170 = vmatpush3.bf16.msra.mxu0 %v1372_v44 }
  0x29   :  { %1192 = vmatpush3.bf16.msra.mxu1 %v1373_v45  ;;  %1171 = vmatprep.subr.bf16.mxu0 %v1374_v46 }
  0x2a   :  { %1193 = vmatprep.subr.bf16.mxu1 %v1375_v47 }
  0x2c   :  { %1172 = vmatpush3.bf16.msra.mxu0 %v1376_v48  ;;  %v1412_v48 = vmov 1.0|1.0  }
  0x2d   :  { %1194 = vmatpush3.bf16.msra.mxu1 %v1377_v49  ;;  %1173 = vmatprep.subr.bf16.mxu0 %v1378_v50 }
  0x2e   :  { %1195 = vmatprep.subr.bf16.mxu1 %v1379_v51 }
  0x30   :  { %1174 = vmatpush3.bf16.msra.mxu0 %v1380_v52 }
  0x31   :  { %1196 = vmatpush3.bf16.msra.mxu1 %v1381_v53  ;;  %1175 = vmatprep.subr.bf16.mxu0 %v1382_v54 }
  0x32   :  { %1197 = vmatprep.subr.bf16.mxu1 %v1383_v55 }
  0x34   :  { %1176 = vmatpush3.bf16.msra.mxu0 %v1384_v56 }
  0x35   :  { %1198 = vmatpush3.bf16.msra.mxu1 %v1385_v57  ;;  %1177 = vmatprep.subr.bf16.mxu0 %v1386_v58 }
  0x36   :  { %1199 = vmatprep.subr.bf16.mxu1 %v1387_v59  ;;  %v1095_v59 = vld [vmem:[%s1788_s4] ss:$0 sm:$0xff] }
  0x38   :  { %1178 = vmatpush3.bf16.msra.mxu0 %v1388_v60 }
  0x39   :  { %1200 = vmatpush3.bf16.msra.mxu1 %v1389_v61  ;;  %1179 = vmatprep.subr.bf16.mxu0 %v1390_v62 }
  0x3a   :  { %1201 = vmatprep.subr.bf16.mxu1 %v1391_v63 }
  0x3c   :  { %1180 = vmatpush3.bf16.msra.mxu0 %v1392_v0 }
  0x3d   :  { %1202 = vmatpush3.bf16.msra.mxu1 %v1393_v1  ;;  %1181 = vmatprep.subr.bf16.mxu0 %v1394_v2 }
  0x3e   :  { %1203 = vmatprep.subr.bf16.mxu1 %v1395_v3 }
  0x40   :  { %1182 = vmatpush3.bf16.msra.mxu0 %v1396_v4 }
  0x41   :  { %1204 = vmatpush3.bf16.msra.mxu1 %v1397_v5  ;;  %1247 = vmatprep.subr.bf16.mxu0 %v1410_v12 }
  0x42   :  { %1267 = vmatprep.subr.bf16.mxu1 %v1410_v12 }
  0x43   :  { %685 = vmatmul.mubr.bf16.vlgmr.msra.gmra.mxu0 %v1027_v7 }
  0x44   :  { %725 = vmatmul.mubr.bf16.vlgmr.msra.gmra.mxu1 %v1029_v10  ;;  %1248 = vmatpush3.bf16.msra.mxu0 %v1651_v13 }
  0x45   :  { %1268 = vmatpush3.bf16.msra.mxu1 %v1651_v13  ;;  %1249 = vmatprep.subr.bf16.mxu0 %v1410_v12 }
  0x46   :  { %1269 = vmatprep.subr.bf16.mxu1 %v1410_v12  ;;  %1263 = vmatprep.mubr.msk.bf16.mxu0 %vm1411_vm0, %v1410_v12 }
  0x47   :  { %1283 = vmatprep.mubr.msk.bf16.mxu1 %vm1411_vm0, %v1410_v12 }
  0x48   :  { %1250 = vmatpush3.bf16.msra.mxu0 %v1658_v14 }
  0x49   :  { %1270 = vmatpush3.bf16.msra.mxu1 %v1658_v14  ;;  %1251 = vmatprep.subr.bf16.mxu0 %v1410_v12 }
  0x4a   :  { %1271 = vmatprep.subr.bf16.mxu1 %v1410_v12 }
  0x4c   :  { %1252 = vmatpush3.bf16.msra.mxu0 %v1666_v15 }
  0x4d   :  { %1272 = vmatpush3.bf16.msra.mxu1 %v1666_v15  ;;  %1253 = vmatprep.subr.bf16.mxu0 %v1410_v12 }
  0x4e   :  { %1273 = vmatprep.subr.bf16.mxu1 %v1410_v12 }
  0x50   :  { %1254 = vmatpush3.bf16.msra.mxu0 %v1676_v16 }
  0x51   :  { %1274 = vmatpush3.bf16.msra.mxu1 %v1676_v16  ;;  %1255 = vmatprep.subr.bf16.mxu0 %v1410_v12 }
  0x52   :  { %1275 = vmatprep.subr.bf16.mxu1 %v1410_v12 }
  0x54   :  { %1256 = vmatpush3.bf16.msra.mxu0 %v1685_v17 }
  0x55   :  { %1276 = vmatpush3.bf16.msra.mxu1 %v1685_v17  ;;  %1257 = vmatprep.subr.bf16.mxu0 %v1410_v12 }
  0x56   :  { %1277 = vmatprep.subr.bf16.mxu1 %v1410_v12 }
  0x58   :  { %1258 = vmatpush3.bf16.msra.mxu0 %v1694_v18 }
  0x59   :  { %1278 = vmatpush3.bf16.msra.mxu1 %v1694_v18  ;;  %1259 = vmatprep.subr.bf16.mxu0 %v1410_v12 }
  0x5a   :  { %1279 = vmatprep.subr.bf16.mxu1 %v1410_v12 }
  0x5c   :  { %1260 = vmatpush3.bf16.msra.mxu0 %v1706_v19 }
  0x5d   :  { %1280 = vmatpush3.bf16.msra.mxu1 %v1706_v19  ;;  %1261 = vmatprep.subr.bf16.mxu0 %v1410_v12 }
  0x5e   :  { %1281 = vmatprep.subr.bf16.mxu1 %v1410_v12 }
  0x60   :  { %1262 = vmatpush3.bf16.msra.mxu0 %v1715_v20 }
  0x61   :  { %1282 = vmatpush3.bf16.msra.mxu1 %v1715_v20  ;;  %1287 = vmatprep.subr.bf16.mxu0 %v1410_v12 }
  0x62   :  { %1307 = vmatprep.subr.bf16.mxu1 %v1410_v12 }
  0xe3   :  { %v1139_v21 = vpop.f32.mrf.mxu0 }
  0xe4   :  { %v1161_v22 = vpop.f32.mrf.mxu1 }
  0xe5   :  { %v1140_v23 = vpop.f32.mrf.mxu0 }
  0xe6   :  { %v1162_v24 = vpop.f32.mrf.mxu1  ;;  %v1141_v29 = vadd.f32 %v1140_v23, %v1139_v21 }
  0xe7   :  { %v1142_v25 = vpop.f32.mrf.mxu0  ;;  %v1163_v32 = vadd.f32 %v1162_v24, %v1161_v22 }
  0xe8   :  { %v1164_v26 = vpop.f32.mrf.mxu1  ;;  %v607_v31 = vadd.f32 %v1141_v29, %v1022_v30 }
  0xe9   :  { %v1143_v27 = vpop.f32.mrf.mxu0 }
  0xea   :  { %v1165_v28 = vpop.f32.mrf.mxu1  ;;  %v647_v37 = vadd.f32 %v1163_v32, %v607_v31 }
 0x103   :  { %v1183_v33 = vpop.f32.mrf.mxu0 }
 0x104   :  { %v1205_v34 = vpop.f32.mrf.mxu1 }
 0x105   :  { %v1184_v35 = vpop.f32.mrf.mxu0 }
 0x106   :  { %v1206_v36 = vpop.f32.mrf.mxu1  ;;  %v1185_v38 = vadd.f32 %v1184_v35, %v1183_v33 }
 0x107   :  { %v1186_v39 = vpop.f32.mrf.mxu0  ;;  %v1207_v42 = vadd.f32 %v1206_v36, %v1205_v34 }
 0x108   :  { %v1208_v40 = vpop.f32.mrf.mxu1  ;;  %v687_v41 = vadd.f32 %v1185_v38, %v647_v37 }
 0x109   :  { %v1187_v43 = vpop.f32.mrf.mxu0 }
 0x10a   :  { %v1209_v44 = vpop.f32.mrf.mxu1  ;;  %v727_v45 = vadd.f32 %v1207_v42, %v687_v41 }
 0x10c   :  { %vm756_vm1 = vcmp.gt.f32.partialorder %v727_v45, 1.0 }
 0x10d   :  { %v1096_v46 = vsel %vm756_vm1, 1.0, %v1410_v12  ;;  %vm1105_vm2 = vmpackc.low %vm756_vm1, %vm756_vm1 }
 0x10e   :  { %v759_v47 = vsub.f32 %v727_v45, %v1096_v46  ;;  %1264 = vmatmul.mubr.msk.bf16.vlgmr.msra.gmra.mxu0 %vm1105_vm2, %v1412_v48 }
 0x10f   :  { %1288 = vmatpush3.bf16.msra.mxu0 %v1651_v13  ;;  %1303 = vmatprep.mubr.msk.bf16.mxu0 %vm1411_vm0, %v1410_v12 }
 0x110   :  { %v855_v49 = vmul.f32 0.9, %v759_v47  ;;  %1289 = vmatprep.subr.bf16.mxu0 %v1410_v12 }
 0x112   :  { %v856_v50 = vadd.f32 %v855_v49, %v727_v45 }
 0x113   :  { %1290 = vmatpush3.bf16.msra.mxu0 %v1658_v14 }
 0x114   :  { %1291 = vmatprep.subr.bf16.mxu0 %v1410_v12  ;;  %vm857_vm3 = vcmp.gt.f32.partialorder %v856_v50, 1.0 }
 0x115   :  { %v1108_v51 = vsel %vm857_vm3, 1.0, %v1410_v12  ;;  %vm1109_vm4 = vmpackc.low %vm857_vm3, %vm857_vm3 }
 0x116   :  { %v860_v52 = vsub.f32 %v856_v50, %v1108_v51  ;;  %1284 = vmatmul.mubr.msk.bf16.vlgmr.msra.gmra.mxu1 %vm1109_vm4, %v1412_v48 }
 0x117   :  { %1292 = vmatpush3.bf16.msra.mxu0 %v1666_v15  ;;  %1308 = vmatpush3.bf16.msra.mxu1 %v1651_v13 }
 0x118   :  { %v910_v53 = vmul.f32 0.9, %v860_v52  ;;  %1293 = vmatprep.subr.bf16.mxu0 %v1410_v12  ;;  %1309 = vmatprep.subr.bf16.mxu1 %v1410_v12 }
 0x119   :  { %1323 = vmatprep.mubr.msk.bf16.mxu1 %vm1411_vm0, %v1410_v12 }
 0x11a   :  { %v911_v54 = vadd.f32 %v910_v53, %v727_v45 }
 0x11b   :  { %1294 = vmatpush3.bf16.msra.mxu0 %v1676_v16  ;;  %1310 = vmatpush3.bf16.msra.mxu1 %v1658_v14 }
 0x11c   :  { %1295 = vmatprep.subr.bf16.mxu0 %v1410_v12  ;;  %1311 = vmatprep.subr.bf16.mxu1 %v1410_v12  ;;  %vm912_vm5 = vcmp.gt.f32.partialorder %v911_v54, 1.0 }
 0x11d   :  { %v1113_v55 = vsel %vm912_vm5, 1.0, %v1410_v12  ;;  %vm1114_vm6 = vmpackc.low %vm912_vm5, %vm912_vm5 }
 0x11e   :  { %v915_v56 = vsub.f32 %v911_v54, %v1113_v55 }
 0x11f   :  { %1296 = vmatpush3.bf16.msra.mxu0 %v1685_v17  ;;  %1312 = vmatpush3.bf16.msra.mxu1 %v1666_v15 }
 0x120   :  { %1297 = vmatprep.subr.bf16.mxu0 %v1410_v12  ;;  %1313 = vmatprep.subr.bf16.mxu1 %v1410_v12  ;;  %v965_v57 = vmul.f32 0.9, %v915_v56 }
 0x122   :  { %v966_v58 = vadd.f32 %v965_v57, %v727_v45 }
 0x123   :  { %1298 = vmatpush3.bf16.msra.mxu0 %v1694_v18  ;;  %1314 = vmatpush3.bf16.msra.mxu1 %v1676_v16 }
 0x124   :  { %1299 = vmatprep.subr.bf16.mxu0 %v1410_v12  ;;  %1315 = vmatprep.subr.bf16.mxu1 %v1410_v12  ;;  %vm967_vm7 = vcmp.gt.f32.partialorder %v966_v58, 1.0 }
 0x125   :  { %vm1119_vm8 = vmpackc.low %vm967_vm7, %vm967_vm7 }
 0x127   :  { %1300 = vmatpush3.bf16.msra.mxu0 %v1706_v19  ;;  %1316 = vmatpush3.bf16.msra.mxu1 %v1685_v17 }
 0x128   :  { %1301 = vmatprep.subr.bf16.mxu0 %v1410_v12  ;;  %1317 = vmatprep.subr.bf16.mxu1 %v1410_v12 }
 0x12b   :  { %1302 = vmatpush3.bf16.msra.mxu0 %v1715_v20  ;;  %1318 = vmatpush3.bf16.msra.mxu1 %v1694_v18 }
 0x12c   :  { %1319 = vmatprep.subr.bf16.mxu1 %v1410_v12 }
 0x12e   :  { %1304 = vmatmul.mubr.msk.bf16.vlgmr.msra.gmra.mxu0 %vm1114_vm6, %v1412_v48 }
 0x12f   :  { %1320 = vmatpush3.bf16.msra.mxu1 %v1706_v19 }
 0x130   :  { %1321 = vmatprep.subr.bf16.mxu1 %v1410_v12 }
 0x133   :  { %1322 = vmatpush3.bf16.msra.mxu1 %v1715_v20 }
 0x136   :  { %1324 = vmatmul.mubr.msk.bf16.vlgmr.msra.gmra.mxu1 %vm1119_vm8, %v1412_v48 }
 0x1ce   :  { %v843_v60 = vpop.f32.mrf.mxu0 }
 0x1cf   :  { %v844_v61 = vadd.f32 %v1095_v59, %v843_v60 }
 0x1d0   :  { %v1265_v62 = vpop.f32.mrf.mxu0 }
 0x1d1   :  { %vm850_vm9 = vcmp.gt.f32.partialorder %v844_v61, 1.0 }
 0x1d2   :  { %v1107_v63 = vsel %vm850_vm9, 1.0, %v1410_v12  ;;  %v846_v0 = vpop.f32.mrf.mxu0 }
 0x1d3   :  { %v853_v1 = vsub.f32 %v844_v61, %v1107_v63  ;;  %854 = vst [vmem:[%s1789_s5] sm:$0xff] %v1107_v63 }
 0x1d4   :  { %v1266_v2 = vpop.f32.mrf.mxu0 }
 0x1d5   :  { %v902_v4 = vmul.f32 0.9, %v853_v1 }
 0x1d6   :  { %v896_v3 = vpop.f32.mrf.mxu1 }
 0x1d7   :  { %v897_v5 = vadd.f32 %v1095_v59, %v896_v3 }
 0x1d8   :  { %v1285_v6 = vpop.f32.mrf.mxu1 }
 0x1d9   :  { %v903_v7 = vadd.f32 %v902_v4, %v897_v5 }
 0x1da   :  { %v899_v8 = vpop.f32.mrf.mxu1 }
 0x1db   :  { %vm904_vm10 = vcmp.gt.f32.partialorder %v903_v7, 1.0 }
 0x1dc   :  { %v1111_v9 = vsel %vm904_vm10, 1.0, %v1410_v12  ;;  %v1286_v10 = vpop.f32.mrf.mxu1 }
 0x1dd   :  { %1112 = vst [vmem:[%s1789_s5 + $0x8] sm:$0xff] %v1111_v9  ;;  %v907_v11 = vsub.f32 %v903_v7, %v1111_v9 }
 0x1df   :  { %v957_v15 = vmul.f32 0.9, %v907_v11 }
 0x1ee   :  { %v951_v13 = vpop.f32.mrf.mxu0 }
 0x1ef   :  { %v952_v14 = vadd.f32 %v1095_v59, %v951_v13 }
 0x1f0   :  { %v1305_v16 = vpop.f32.mrf.mxu0 }
 0x1f1   :  { %v958_v17 = vadd.f32 %v957_v15, %v952_v14 }
 0x1f2   :  { %v954_v18 = vpop.f32.mrf.mxu0 }
 0x1f3   :  { %vm959_vm11 = vcmp.gt.f32.partialorder %v958_v17, 1.0 }
 0x1f4   :  { %v1116_v19 = vsel %vm959_vm11, 1.0, %v1410_v12  ;;  %v1306_v20 = vpop.f32.mrf.mxu0 }
 0x1f5   :  { %v962_v21 = vsub.f32 %v958_v17, %v1116_v19  ;;  %1117 = vst [vmem:[%s1789_s5 + $0x10] sm:$0xff] %v1116_v19 }
 0x1f6   :  { %v1005_v22 = vpop.f32.mrf.mxu1 }
 0x1f7   :  { %v1006_v23 = vadd.f32 %v1095_v59, %v1005_v22  ;;  %v1011_v24 = vmul.f32 0.9, %v962_v21 }
 0x1f8   :  { %v1325_v25 = vpop.f32.mrf.mxu1 }
 0x1f9   :  { %v1012_v26 = vadd.f32 %v1011_v24, %v1006_v23 }
 0x1fa   :  { %v1008_v27 = vpop.f32.mrf.mxu1 }
 0x1fb   :  { %vm1013_vm12 = vcmp.gt.f32.partialorder %v1012_v26, 1.0 }
 0x1fc   :  { %v1121_v28 = vsel %vm1013_vm12, 1.0, %v1410_v12  ;;  %v1326_v29 = vpop.f32.mrf.mxu1 }
 0x1fd   :  { %1122 = vst [vmem:[%s1789_s5 + $0x18] sm:$0xff] %v1121_v28 }

</bundles_post_ra>
